<compile_context>
chip_gen: v5e
topology: v5e:2x2
jax: 0.10.0
libtpu: 0.0.40
codegen_flags: <defaults>
</compile_context>

<pallas_src>
import functools

import jax
import jax.numpy as jnp
from jax import lax
from jax.experimental import pallas as pl
from jax.experimental.pallas import tpu as pltpu

BN_EPS = 1e-5
LANE = 128


def _round_up(a: int, b: int) -> int:
    return ((a + b - 1) // b) * b


# ---------------------------------------------------------------------------
# Pass 1: conv-as-matmul tiles + global per-channel sum / sumsq accumulation.
# ---------------------------------------------------------------------------
def _conv_stats_kernel(p_ref, w_ref, y_ref, sum_ref, sumsq_ref):
    # p_ref:     (TM, K)      bf16  pre-activated (ReLU'd) im2col patches
    # w_ref:     (K, C_pad)   bf16  conv weight (transposed, channel-padded)
    # y_ref:     (TM, C_pad)  f32   raw conv output tile
    # sum_ref:   (1, C_pad)   f32   accumulator, resident across the M grid
    # sumsq_ref: (1, C_pad)   f32   accumulator, resident across the M grid
    @pl.when(pl.program_id(0) == 0)
    def _init():
        sum_ref[...] = jnp.zeros_like(sum_ref)
        sumsq_ref[...] = jnp.zeros_like(sumsq_ref)

    y = jnp.dot(p_ref[...], w_ref[...], preferred_element_type=jnp.float32)
    y_ref[...] = y
    sum_ref[...] += jnp.sum(y, axis=0, keepdims=True)
    sumsq_ref[...] += jnp.sum(y * y, axis=0, keepdims=True)


# ---------------------------------------------------------------------------
# Pass 2: normalize with folded per-channel scale/shift (one FMA per element).
# ---------------------------------------------------------------------------
def _bn_apply_kernel(y_ref, scale_ref, shift_ref, out_ref):
    out_ref[...] = y_ref[...] * scale_ref[...] + shift_ref[...]


def _im2col(x, kh, kw, stride, padding):
    """x: (N, C, H, W) -> patches (N*Ho*Wo, C*kh*kw), K ordered (C, kh, kw)."""
    n, c, h, w = x.shape
    xp = jnp.pad(x, ((0, 0), (0, 0), (padding, padding), (padding, padding)))
    ho = (h + 2 * padding - kh) // stride + 1
    wo = (w + 2 * padding - kw) // stride + 1
    cols = []
    for i in range(kh):
        for j in range(kw):
            cols.append(
                xp[:, :, i: i + (ho - 1) * stride + 1: stride,
                          j: j + (wo - 1) * stride + 1: stride])  # (N,C,Ho,Wo)
    patches = jnp.stack(cols, axis=2)               # (N, C, kh*kw, Ho, Wo)
    patches = patches.transpose(0, 3, 4, 1, 2)       # (N, Ho, Wo, C, kh*kw)
    return patches.reshape(n * ho * wo, c * kh * kw), ho, wo


@functools.partial(jax.jit, static_argnames=("stride", "padding"))
def relu_conv_bn(x, weight, gamma, beta, *, stride, padding):
    """Forward pass of ReLUConvBN.

    x:      (N, C_in, H, W)        f32 (NCHW, PyTorch layout)
    weight: (C_out, C_in, KH, KW)  f32 (PyTorch conv weight layout)
    gamma:  (C_out,), beta: (C_out,)  BatchNorm affine params
    returns (N, C_out, Ho, Wo) f32
    """
    n, c_in, h, w = x.shape
    c_out, _, kh, kw = weight.shape
    k = c_in * kh * kw

    # ReLU before im2col (identical result), bf16 for the HBM/MXU-heavy path.
    x_act = jnp.maximum(x, 0.0).astype(jnp.bfloat16)
    patches, ho, wo = _im2col(x_act, kh, kw, stride, padding)    # (M, K) bf16
    m = patches.shape[0]

    # Lane-dense channel padding and M tiling (multiple of 16 for bf16 tiles).
    c_pad = _round_up(c_out, LANE)
    tm = min(1024, _round_up(m, 16))
    m_pad = _round_up(m, tm)
    num_tiles = m_pad // tm
    if m_pad != m:
        # Zero rows: contribute nothing to sum/sumsq; sliced off at the end.
        patches = jnp.pad(patches, ((0, m_pad - m), (0, 0)))

    w_t = weight.reshape(c_out, k).T                              # (K, C_out)
    w_pad = jnp.pad(w_t, ((0, 0), (0, c_pad - c_out))).astype(jnp.bfloat16)

    # ---- Pass 1: pipelined conv tiles + global BN statistics ---------------
    y, ysum, ysumsq = pl.pallas_call(
        _conv_stats_kernel,
        out_shape=(
            jax.ShapeDtypeStruct((m_pad, c_pad), jnp.float32),
            jax.ShapeDtypeStruct((1, c_pad), jnp.float32),
            jax.ShapeDtypeStruct((1, c_pad), jnp.float32),
        ),
        grid=(num_tiles,),
        in_specs=[
            pl.BlockSpec((tm, k), lambda i: (i, 0)),
            pl.BlockSpec((k, c_pad), lambda i: (0, 0)),
        ],
        out_specs=(
            pl.BlockSpec((tm, c_pad), lambda i: (i, 0)),
            pl.BlockSpec((1, c_pad), lambda i: (0, 0)),
            pl.BlockSpec((1, c_pad), lambda i: (0, 0)),
        ),
        compiler_params=pltpu.CompilerParams(
            dimension_semantics=("arbitrary",),   # stats accumulate across tiles
            vmem_limit_bytes=48 << 20,            # fits v7x's 64 MiB with headroom
        ),
    )(patches, w_pad)

    # ---- Fold BN stats into per-channel scale / shift (tiny, f32) ----------
    mean = ysum[0] / float(m)
    var = jnp.maximum(ysumsq[0] / float(m) - mean * mean, 0.0)
    inv_std = lax.rsqrt(var + BN_EPS)
    gamma_p = jnp.pad(gamma.astype(jnp.float32), (0, c_pad - c_out))
    beta_p = jnp.pad(beta.astype(jnp.float32), (0, c_pad - c_out))
    scale = (gamma_p * inv_std).reshape(1, c_pad)
    shift = (beta_p - mean * gamma_p * inv_std).reshape(1, c_pad)

    # ---- Pass 2: normalize in place on the y buffer, tile-parallel ---------
    out = pl.pallas_call(
        _bn_apply_kernel,
        out_shape=jax.ShapeDtypeStruct((m_pad, c_pad), jnp.float32),
        grid=(num_tiles,),
        in_specs=[
            pl.BlockSpec((tm, c_pad), lambda i: (i, 0)),
            pl.BlockSpec((1, c_pad), lambda i: (0, 0)),
            pl.BlockSpec((1, c_pad), lambda i: (0, 0)),
        ],
        out_specs=pl.BlockSpec((tm, c_pad), lambda i: (i, 0)),
        input_output_aliases={0: 0},
        compiler_params=pltpu.CompilerParams(
            dimension_semantics=("parallel",),    # both TCs on v7x
            vmem_limit_bytes=48 << 20,
        ),
    )(y, scale, shift)

    # Slice off M / channel padding, back to NCHW (module interface).
    out = out[:m, :c_out].reshape(n, ho, wo, c_out)
    return out.transpose(0, 3, 1, 2)


def _reference(x, weight, gamma, beta, *, stride, padding):
    """Pure-JAX f32 reference (lax conv + training-mode BN) for validation."""
    xr = jnp.maximum(x, 0.0)
    y = lax.conv_general_dilated(
        xr, weight, window_strides=(stride, stride),
        padding=[(padding, padding), (padding, padding)],
        dimension_numbers=("NCHW", "OIHW", "NCHW"),
    )
    mean = jnp.mean(y, axis=(0, 2, 3), keepdims=True)
    var = jnp.mean((y - mean) ** 2, axis=(0, 2, 3), keepdims=True)
    y = (y - mean) * lax.rsqrt(var + BN_EPS)
    return y * gamma.reshape(1, -1, 1, 1) + beta.reshape(1, -1, 1, 1)


if __name__ == "__main__":
    # ReLUConvBN(C_in=4, C_out=8, kernel_size=3, stride=1, padding=1, affine=True)
    C_in, C_out, K, STRIDE, PAD = 4, 8, 3, 1, 1
    N, H, W = 2, 16, 16

    key = jax.random.PRNGKey(0)
    kx, kw = jax.random.split(key)
    x = jax.random.normal(kx, (N, C_in, H, W), dtype=jnp.float32)
    weight = 0.1 * jax.random.normal(kw, (C_out, C_in, K, K), dtype=jnp.float32)
    gamma = jnp.ones((C_out,), dtype=jnp.float32)   # nn.BatchNorm2d default affine init
    beta = jnp.zeros((C_out,), dtype=jnp.float32)

    out = relu_conv_bn(x, weight, gamma, beta, stride=STRIDE, padding=PAD)
    out = jax.block_until_ready(out)

    ref = _reference(x, weight, gamma, beta, stride=STRIDE, padding=PAD)
    assert out.shape == (N, C_out, H, W)
    # Tolerance loosened vs pure-f32 because the MXU inputs are bf16
    # (accumulation and BN math are f32); BN outputs are ~unit scale.
    assert jnp.allclose(out, ref, atol=5e-2, rtol=5e-2), "mismatch vs reference"

    print("KERNEL_OK")
</pallas_src>

<mosaic_0001>
module attributes {stable_mosaic.version = 11 : i64} {
  func.func @_conv_stats_kernel(%arg0: i32, %arg1: memref<512x36xbf16, #tpu.memory_space<vmem>>, %arg2: memref<36x128xbf16, #tpu.memory_space<vmem>>, %arg3: memref<512x128xf32, #tpu.memory_space<vmem>>, %arg4: memref<1x128xf32, #tpu.memory_space<vmem>>, %arg5: memref<1x128xf32, #tpu.memory_space<vmem>>) attributes {dimension_semantics = [#tpu.dimension_semantics<arbitrary>], iteration_bounds = array<i64: 1>, scalar_prefetch = 0 : i64, scratch_operands = 0 : i64, tpu.core_type = #tpu.core_type<tc>, window_params = [{transform_indices = @transform_0, window_bounds = array<i64: 512, 36>}, {pipeline_mode = #tpu.pipeline_mode<synchronous>, transform_indices = @transform_1, window_bounds = array<i64: 36, 128>}, {transform_indices = @transform_2, window_bounds = array<i64: 512, 128>}, {pipeline_mode = #tpu.pipeline_mode<synchronous>, transform_indices = @transform_3, window_bounds = array<i64: 1, 128>}, {pipeline_mode = #tpu.pipeline_mode<synchronous>, transform_indices = @transform_4, window_bounds = array<i64: 1, 128>}]} {
    %c0_i32 = arith.constant 0 : i32
    %0 = arith.cmpi eq, %arg0, %c0_i32 : i32
    %1 = arith.extui %0 : i1 to i32
    %c0_i32_0 = arith.constant 0 : i32
    %2 = arith.cmpi ne, %1, %c0_i32_0 : i32
    scf.if %2 {
      %cst_16 = arith.constant 0.000000e+00 : f32
      %18 = vector.broadcast %cst_16 : f32 to vector<1x128xf32>
      %c0_17 = arith.constant 0 : index
      %c0_18 = arith.constant 0 : index
      %19 = vector.load %arg4[%c0_17, %c0_18] : memref<1x128xf32, #tpu.memory_space<vmem>>, vector<1x128xf32>
      tpu.vector_store %arg4[%c0_17, %c0_18], %18 {strides = array<i32>} : memref<1x128xf32, #tpu.memory_space<vmem>>, vector<1x128xf32>,
      %cst_19 = arith.constant 0.000000e+00 : f32
      %20 = vector.broadcast %cst_19 : f32 to vector<1x128xf32>
      %c0_20 = arith.constant 0 : index
      %c0_21 = arith.constant 0 : index
      %21 = vector.load %arg5[%c0_20, %c0_21] : memref<1x128xf32, #tpu.memory_space<vmem>>, vector<1x128xf32>
      tpu.vector_store %arg5[%c0_20, %c0_21], %20 {strides = array<i32>} : memref<1x128xf32, #tpu.memory_space<vmem>>, vector<1x128xf32>,
    } else {
    }
    %c0 = arith.constant 0 : index
    %c0_1 = arith.constant 0 : index
    %3 = vector.load %arg1[%c0, %c0_1] : memref<512x36xbf16, #tpu.memory_space<vmem>>, vector<512x36xbf16>
    %c0_2 = arith.constant 0 : index
    %c0_3 = arith.constant 0 : index
    %4 = vector.load %arg2[%c0_2, %c0_3] : memref<36x128xbf16, #tpu.memory_space<vmem>>, vector<36x128xbf16>
    %cst = arith.constant dense<0.000000e+00> : vector<512x128xf32>
    %5 = tpu.matmul %3, %4, %cst {dimension_numbers = #tpu.dot_dimension_numbers<[1], [0], [0], [1], [0, 0, 1, 1], [], []>} : vector<512x36xbf16>, vector<36x128xbf16>, vector<512x128xf32> -> vector<512x128xf32>
    %c0_4 = arith.constant 0 : index
    %c0_5 = arith.constant 0 : index
    %6 = vector.load %arg3[%c0_4, %c0_5] : memref<512x128xf32, #tpu.memory_space<vmem>>, vector<512x128xf32>
    tpu.vector_store %arg3[%c0_4, %c0_5], %5 {strides = array<i32>} : memref<512x128xf32, #tpu.memory_space<vmem>>, vector<512x128xf32>,
    %c0_6 = arith.constant 0 : index
    %c0_7 = arith.constant 0 : index
    %7 = vector.load %arg4[%c0_6, %c0_7] : memref<1x128xf32, #tpu.memory_space<vmem>>, vector<1x128xf32>
    %cst_8 = arith.constant dense<0.000000e+00> : vector<128xf32>
    %8 = vector.multi_reduction <add>, %5, %cst_8 [0] : vector<512x128xf32> to vector<128xf32>
    %9 = vector.shape_cast %8 : vector<128xf32> to vector<1x128xf32>
    %10 = arith.addf %7, %9 : vector<1x128xf32>
    %c0_9 = arith.constant 0 : index
    %c0_10 = arith.constant 0 : index
    %11 = vector.load %arg4[%c0_9, %c0_10] : memref<1x128xf32, #tpu.memory_space<vmem>>, vector<1x128xf32>
    tpu.vector_store %arg4[%c0_9, %c0_10], %10 {strides = array<i32>} : memref<1x128xf32, #tpu.memory_space<vmem>>, vector<1x128xf32>,
    %c0_11 = arith.constant 0 : index
    %c0_12 = arith.constant 0 : index
    %12 = vector.load %arg5[%c0_11, %c0_12] : memref<1x128xf32, #tpu.memory_space<vmem>>, vector<1x128xf32>
    %13 = arith.mulf %5, %5 : vector<512x128xf32>
    %cst_13 = arith.constant dense<0.000000e+00> : vector<128xf32>
    %14 = vector.multi_reduction <add>, %13, %cst_13 [0] : vector<512x128xf32> to vector<128xf32>
    %15 = vector.shape_cast %14 : vector<128xf32> to vector<1x128xf32>
    %16 = arith.addf %12, %15 : vector<1x128xf32>
    %c0_14 = arith.constant 0 : index
    %c0_15 = arith.constant 0 : index
    %17 = vector.load %arg5[%c0_14, %c0_15] : memref<1x128xf32, #tpu.memory_space<vmem>>, vector<1x128xf32>
    tpu.vector_store %arg5[%c0_14, %c0_15], %16 {strides = array<i32>} : memref<1x128xf32, #tpu.memory_space<vmem>>, vector<1x128xf32>,
    return
  }
  func.func @transform_0(%arg0: i32) -> (i32, i32) {
    %c0_i32 = arith.constant 0 : i32
    %c0_i32_0 = arith.constant 0 : i32
    return %arg0, %c0_i32 : i32, i32
  }
  func.func @transform_1(%arg0: i32) -> (i32, i32) {
    %c0_i32 = arith.constant 0 : i32
    %c0_i32_0 = arith.constant 0 : i32
    %c0_i32_1 = arith.constant 0 : i32
    return %c0_i32, %c0_i32_0 : i32, i32
  }
  func.func @transform_2(%arg0: i32) -> (i32, i32) {
    %c0_i32 = arith.constant 0 : i32
    %c0_i32_0 = arith.constant 0 : i32
    return %arg0, %c0_i32 : i32, i32
  }
  func.func @transform_3(%arg0: i32) -> (i32, i32) {
    %c0_i32 = arith.constant 0 : i32
    %c0_i32_0 = arith.constant 0 : i32
    %c0_i32_1 = arith.constant 0 : i32
    return %c0_i32, %c0_i32_0 : i32, i32
  }
  func.func @transform_4(%arg0: i32) -> (i32, i32) {
    %c0_i32 = arith.constant 0 : i32
    %c0_i32_0 = arith.constant 0 : i32
    %c0_i32_1 = arith.constant 0 : i32
    return %c0_i32, %c0_i32_0 : i32, i32
  }
}

module attributes {stable_mosaic.version = 11 : i64} {
  func.func @_bn_apply_kernel(%arg0: i32, %arg1: memref<512x128xf32, #tpu.memory_space<vmem>>, %arg2: memref<1x128xf32, #tpu.memory_space<vmem>>, %arg3: memref<1x128xf32, #tpu.memory_space<vmem>>, %arg4: memref<512x128xf32, #tpu.memory_space<vmem>>) attributes {dimension_semantics = [#tpu.dimension_semantics<parallel>], iteration_bounds = array<i64: 1>, scalar_prefetch = 0 : i64, scratch_operands = 0 : i64, tpu.core_type = #tpu.core_type<tc>, window_params = [{transform_indices = @transform_0, window_bounds = array<i64: 512, 128>}, {pipeline_mode = #tpu.pipeline_mode<synchronous>, transform_indices = @transform_1, window_bounds = array<i64: 1, 128>}, {pipeline_mode = #tpu.pipeline_mode<synchronous>, transform_indices = @transform_2, window_bounds = array<i64: 1, 128>}, {transform_indices = @transform_3, window_bounds = array<i64: 512, 128>}]} {
    %c0 = arith.constant 0 : index
    %c0_0 = arith.constant 0 : index
    %0 = vector.load %arg1[%c0, %c0_0] : memref<512x128xf32, #tpu.memory_space<vmem>>, vector<512x128xf32>
    %c0_1 = arith.constant 0 : index
    %c0_2 = arith.constant 0 : index
    %1 = vector.load %arg2[%c0_1, %c0_2] : memref<1x128xf32, #tpu.memory_space<vmem>>, vector<1x128xf32>
    %2 = vector.broadcast %1 : vector<1x128xf32> to vector<512x128xf32>
    %3 = arith.mulf %0, %2 : vector<512x128xf32>
    %c0_3 = arith.constant 0 : index
    %c0_4 = arith.constant 0 : index
    %4 = vector.load %arg3[%c0_3, %c0_4] : memref<1x128xf32, #tpu.memory_space<vmem>>, vector<1x128xf32>
    %5 = vector.broadcast %4 : vector<1x128xf32> to vector<512x128xf32>
    %6 = arith.addf %3, %5 : vector<512x128xf32>
    %c0_5 = arith.constant 0 : index
    %c0_6 = arith.constant 0 : index
    %7 = vector.load %arg4[%c0_5, %c0_6] : memref<512x128xf32, #tpu.memory_space<vmem>>, vector<512x128xf32>
    tpu.vector_store %arg4[%c0_5, %c0_6], %6 {strides = array<i32>} : memref<512x128xf32, #tpu.memory_space<vmem>>, vector<512x128xf32>,
    return
  }
  func.func @transform_0(%arg0: i32) -> (i32, i32) {
    %c0_i32 = arith.constant 0 : i32
    %c0_i32_0 = arith.constant 0 : i32
    return %arg0, %c0_i32 : i32, i32
  }
  func.func @transform_1(%arg0: i32) -> (i32, i32) {
    %c0_i32 = arith.constant 0 : i32
    %c0_i32_0 = arith.constant 0 : i32
    %c0_i32_1 = arith.constant 0 : i32
    return %c0_i32, %c0_i32_0 : i32, i32
  }
  func.func @transform_2(%arg0: i32) -> (i32, i32) {
    %c0_i32 = arith.constant 0 : i32
    %c0_i32_0 = arith.constant 0 : i32
    %c0_i32_1 = arith.constant 0 : i32
    return %c0_i32, %c0_i32_0 : i32, i32
  }
  func.func @transform_3(%arg0: i32) -> (i32, i32) {
    %c0_i32 = arith.constant 0 : i32
    %c0_i32_0 = arith.constant 0 : i32
    return %arg0, %c0_i32 : i32, i32
  }
}

</mosaic_0001>

<bundles_post_ra>
// kernel: relu_conv_bn.3
= control target key start
LH: loop header
LB: loop body
LE: loop exit
PB: predicated region body
PF: predicated region fallthrough
CT: control target
= control target key end

     0   :  { %s829_s0 = inlined_call_operand.vmem [shape: f32[512,128], index: 0, kind: input, shape index: {}, may-alias: {0,3}]   ;;  %s830_s1 = inlined_call_operand.vmem [shape: f32[1,128], index: 1, kind: input, shape index: {}]   ;;  %s831_s2 = inlined_call_operand.vmem [shape: f32[1,128], index: 2, kind: input, shape index: {}]   ;;  %s832_s3 = inlined_call_operand.vmem [shape: f32[512,128], index: 3, kind: output, shape index: {}, may-alias: {0,3}]  }
   0x1   :  { %v14_v0 = vld [vmem:[%s829_s0] sm:$0xff]  ;;  %v15_v3 = vld [vmem:[%s829_s0 + $0x8] sm:$0xff]  ;;  %v16_v6 = vld [vmem:[%s829_s0 + $0x10] sm:$0xff] }
   0x2   :  { %v310_v1 = vld [vmem:[%s830_s1] ss:$0 sm:$0xff]  ;;  %v17_v7 = vld [vmem:[%s829_s0 + $0x18] sm:$0xff]  ;;  %v19_v12 = vld [vmem:[%s829_s0 + $0x28] sm:$0xff] }
   0x3   :  { %v315_v2 = vld [vmem:[%s831_s2] ss:$0 sm:$0xff]  ;;  %v82_v4 = vmul.f32 %v310_v1, %v14_v0  ;;  %v83_v5 = vmul.f32 %v310_v1, %v15_v3  ;;  %v84_v9 = vmul.f32 %v310_v1, %v16_v6  ;;  %v85_v10 = vmul.f32 %v310_v1, %v17_v7  ;;  %v20_v13 = vld [vmem:[%s829_s0 + $0x30] sm:$0xff]  ;;  %v21_v14 = vld [vmem:[%s829_s0 + $0x38] sm:$0xff] }
   0x4   :  { %v18_v8 = vld [vmem:[%s829_s0 + $0x20] sm:$0xff]  ;;  %v87_v17 = vmul.f32 %v310_v1, %v19_v12  ;;  %v88_v18 = vmul.f32 %v310_v1, %v20_v13  ;;  %v23_v20 = vld [vmem:[%s829_s0 + $0x48] sm:$0xff]  ;;  %v89_v23 = vmul.f32 %v310_v1, %v21_v14  ;;  %v24_v24 = vld [vmem:[%s829_s0 + $0x50] sm:$0xff] }
   0x5   :  { %v86_v11 = vmul.f32 %v310_v1, %v18_v8  ;;  %v150_v15 = vadd.f32 %v315_v2, %v82_v4  ;;  %v151_v16 = vadd.f32 %v315_v2, %v83_v5  ;;  %v22_v19 = vld [vmem:[%s829_s0 + $0x40] sm:$0xff]  ;;  %v152_v21 = vadd.f32 %v315_v2, %v84_v9 }
   0x6   :  { %v153_v22 = vadd.f32 %v315_v2, %v85_v10  ;;  %v90_v26 = vmul.f32 %v310_v1, %v22_v19  ;;  %v155_v28 = vadd.f32 %v315_v2, %v87_v17  ;;  %v91_v29 = vmul.f32 %v310_v1, %v23_v20 }
   0x7   :  { %214 = vst [vmem:[%s832_s3] sm:$0xff] %v150_v15  ;;  %v154_v25 = vadd.f32 %v315_v2, %v86_v11  ;;  %v156_v31 = vadd.f32 %v315_v2, %v88_v18  ;;  %v92_v32 = vmul.f32 %v310_v1, %v24_v24  ;;  %v157_v34 = vadd.f32 %v315_v2, %v89_v23 }
   0x8   :  { %v158_v37 = vadd.f32 %v315_v2, %v90_v26  ;;  %v159_v40 = vadd.f32 %v315_v2, %v91_v29 }
   0x9   :  { %v160_v43 = vadd.f32 %v315_v2, %v92_v32 }
   0xe   :  { %v25_v27 = vld [vmem:[%s829_s0 + $0x58] sm:$0xff] }
   0xf   :  { %215 = vst [vmem:[%s832_s3 + $0x8] sm:$0xff] %v151_v16  ;;  %v93_v35 = vmul.f32 %v310_v1, %v25_v27 }
  0x11   :  { %v161_v46 = vadd.f32 %v315_v2, %v93_v35 }
  0x16   :  { %v26_v30 = vld [vmem:[%s829_s0 + $0x60] sm:$0xff] }
  0x17   :  { %216 = vst [vmem:[%s832_s3 + $0x10] sm:$0xff] %v152_v21  ;;  %v94_v38 = vmul.f32 %v310_v1, %v26_v30 }
  0x19   :  { %v162_v49 = vadd.f32 %v315_v2, %v94_v38 }
  0x1e   :  { %v27_v33 = vld [vmem:[%s829_s0 + $0x68] sm:$0xff] }
  0x1f   :  { %217 = vst [vmem:[%s832_s3 + $0x18] sm:$0xff] %v153_v22  ;;  %v95_v41 = vmul.f32 %v310_v1, %v27_v33 }
  0x21   :  { %v163_v52 = vadd.f32 %v315_v2, %v95_v41 }
  0x26   :  { %v28_v36 = vld [vmem:[%s829_s0 + $0x70] sm:$0xff] }
  0x27   :  { %218 = vst [vmem:[%s832_s3 + $0x20] sm:$0xff] %v154_v25  ;;  %v96_v44 = vmul.f32 %v310_v1, %v28_v36 }
  0x29   :  { %v164_v55 = vadd.f32 %v315_v2, %v96_v44 }
  0x2e   :  { %v29_v39 = vld [vmem:[%s829_s0 + $0x78] sm:$0xff] }
  0x2f   :  { %219 = vst [vmem:[%s832_s3 + $0x28] sm:$0xff] %v155_v28  ;;  %v97_v47 = vmul.f32 %v310_v1, %v29_v39 }
  0x31   :  { %v165_v58 = vadd.f32 %v315_v2, %v97_v47 }
  0x36   :  { %v30_v42 = vld [vmem:[%s829_s0 + $0x80] sm:$0xff] }
  0x37   :  { %220 = vst [vmem:[%s832_s3 + $0x30] sm:$0xff] %v156_v31  ;;  %v98_v50 = vmul.f32 %v310_v1, %v30_v42 }
  0x39   :  { %v166_v61 = vadd.f32 %v315_v2, %v98_v50 }
  0x3e   :  { %v31_v45 = vld [vmem:[%s829_s0 + $0x88] sm:$0xff] }
  0x3f   :  { %221 = vst [vmem:[%s832_s3 + $0x38] sm:$0xff] %v157_v34  ;;  %v99_v53 = vmul.f32 %v310_v1, %v31_v45 }
  0x41   :  { %v167_v0 = vadd.f32 %v315_v2, %v99_v53 }
  0x46   :  { %v32_v48 = vld [vmem:[%s829_s0 + $0x90] sm:$0xff] }
  0x47   :  { %222 = vst [vmem:[%s832_s3 + $0x40] sm:$0xff] %v158_v37  ;;  %v100_v56 = vmul.f32 %v310_v1, %v32_v48 }
  0x49   :  { %v168_v5 = vadd.f32 %v315_v2, %v100_v56 }
  0x4e   :  { %v33_v51 = vld [vmem:[%s829_s0 + $0x98] sm:$0xff] }
  0x4f   :  { %223 = vst [vmem:[%s832_s3 + $0x48] sm:$0xff] %v159_v40  ;;  %v101_v59 = vmul.f32 %v310_v1, %v33_v51 }
  0x51   :  { %v169_v8 = vadd.f32 %v315_v2, %v101_v59 }
  0x56   :  { %v34_v54 = vld [vmem:[%s829_s0 + $0xa0] sm:$0xff] }
  0x57   :  { %224 = vst [vmem:[%s832_s3 + $0x50] sm:$0xff] %v160_v43  ;;  %v102_v62 = vmul.f32 %v310_v1, %v34_v54 }
  0x59   :  { %v170_v11 = vadd.f32 %v315_v2, %v102_v62 }
  0x5e   :  { %v35_v57 = vld [vmem:[%s829_s0 + $0xa8] sm:$0xff] }
  0x5f   :  { %225 = vst [vmem:[%s832_s3 + $0x58] sm:$0xff] %v161_v46  ;;  %v103_v3 = vmul.f32 %v310_v1, %v35_v57 }
  0x61   :  { %v171_v14 = vadd.f32 %v315_v2, %v103_v3 }
  0x66   :  { %v36_v60 = vld [vmem:[%s829_s0 + $0xb0] sm:$0xff] }
  0x67   :  { %226 = vst [vmem:[%s832_s3 + $0x60] sm:$0xff] %v162_v49  ;;  %v104_v6 = vmul.f32 %v310_v1, %v36_v60 }
  0x69   :  { %v172_v17 = vadd.f32 %v315_v2, %v104_v6 }
  0x6e   :  { %v37_v63 = vld [vmem:[%s829_s0 + $0xb8] sm:$0xff] }
  0x6f   :  { %227 = vst [vmem:[%s832_s3 + $0x68] sm:$0xff] %v163_v52  ;;  %v105_v9 = vmul.f32 %v310_v1, %v37_v63 }
  0x71   :  { %v173_v20 = vadd.f32 %v315_v2, %v105_v9 }
  0x76   :  { %v38_v4 = vld [vmem:[%s829_s0 + $0xc0] sm:$0xff] }
  0x77   :  { %228 = vst [vmem:[%s832_s3 + $0x70] sm:$0xff] %v164_v55  ;;  %v106_v12 = vmul.f32 %v310_v1, %v38_v4 }
  0x79   :  { %v174_v23 = vadd.f32 %v315_v2, %v106_v12 }
  0x7e   :  { %v39_v7 = vld [vmem:[%s829_s0 + $0xc8] sm:$0xff] }
  0x7f   :  { %229 = vst [vmem:[%s832_s3 + $0x78] sm:$0xff] %v165_v58  ;;  %v107_v15 = vmul.f32 %v310_v1, %v39_v7 }
  0x81   :  { %v175_v26 = vadd.f32 %v315_v2, %v107_v15 }
  0x86   :  { %v40_v10 = vld [vmem:[%s829_s0 + $0xd0] sm:$0xff] }
  0x87   :  { %230 = vst [vmem:[%s832_s3 + $0x80] sm:$0xff] %v166_v61  ;;  %v108_v18 = vmul.f32 %v310_v1, %v40_v10 }
  0x89   :  { %v176_v29 = vadd.f32 %v315_v2, %v108_v18 }
  0x8e   :  { %v41_v13 = vld [vmem:[%s829_s0 + $0xd8] sm:$0xff] }
  0x8f   :  { %231 = vst [vmem:[%s832_s3 + $0x88] sm:$0xff] %v167_v0  ;;  %v109_v21 = vmul.f32 %v310_v1, %v41_v13 }
  0x91   :  { %v177_v32 = vadd.f32 %v315_v2, %v109_v21 }
  0x96   :  { %v42_v16 = vld [vmem:[%s829_s0 + $0xe0] sm:$0xff] }
  0x97   :  { %232 = vst [vmem:[%s832_s3 + $0x90] sm:$0xff] %v168_v5  ;;  %v110_v24 = vmul.f32 %v310_v1, %v42_v16 }
  0x99   :  { %v178_v35 = vadd.f32 %v315_v2, %v110_v24 }
  0x9e   :  { %v43_v19 = vld [vmem:[%s829_s0 + $0xe8] sm:$0xff] }
  0x9f   :  { %233 = vst [vmem:[%s832_s3 + $0x98] sm:$0xff] %v169_v8  ;;  %v111_v27 = vmul.f32 %v310_v1, %v43_v19 }
  0xa1   :  { %v179_v38 = vadd.f32 %v315_v2, %v111_v27 }
  0xa6   :  { %v44_v22 = vld [vmem:[%s829_s0 + $0xf0] sm:$0xff] }
  0xa7   :  { %234 = vst [vmem:[%s832_s3 + $0xa0] sm:$0xff] %v170_v11  ;;  %v112_v30 = vmul.f32 %v310_v1, %v44_v22 }
  0xa9   :  { %v180_v42 = vadd.f32 %v315_v2, %v112_v30 }
  0xae   :  { %v45_v25 = vld [vmem:[%s829_s0 + $0xf8] sm:$0xff] }
  0xaf   :  { %235 = vst [vmem:[%s832_s3 + $0xa8] sm:$0xff] %v171_v14  ;;  %v113_v33 = vmul.f32 %v310_v1, %v45_v25 }
  0xb1   :  { %v181_v45 = vadd.f32 %v315_v2, %v113_v33 }
  0xb6   :  { %v46_v28 = vld [vmem:[%s829_s0 + $0x100] sm:$0xff] }
  0xb7   :  { %236 = vst [vmem:[%s832_s3 + $0xb0] sm:$0xff] %v172_v17  ;;  %v114_v36 = vmul.f32 %v310_v1, %v46_v28 }
  0xb9   :  { %v182_v49 = vadd.f32 %v315_v2, %v114_v36 }
  0xbe   :  { %v47_v31 = vld [vmem:[%s829_s0 + $0x108] sm:$0xff] }
  0xbf   :  { %237 = vst [vmem:[%s832_s3 + $0xb8] sm:$0xff] %v173_v20  ;;  %v115_v39 = vmul.f32 %v310_v1, %v47_v31 }
  0xc1   :  { %v183_v52 = vadd.f32 %v315_v2, %v115_v39 }
  0xc6   :  { %v48_v34 = vld [vmem:[%s829_s0 + $0x110] sm:$0xff] }
  0xc7   :  { %238 = vst [vmem:[%s832_s3 + $0xc0] sm:$0xff] %v174_v23  ;;  %v116_v43 = vmul.f32 %v310_v1, %v48_v34 }
  0xc9   :  { %v184_v56 = vadd.f32 %v315_v2, %v116_v43 }
  0xce   :  { %v49_v37 = vld [vmem:[%s829_s0 + $0x118] sm:$0xff] }
  0xcf   :  { %239 = vst [vmem:[%s832_s3 + $0xc8] sm:$0xff] %v175_v26  ;;  %v117_v46 = vmul.f32 %v310_v1, %v49_v37 }
  0xd1   :  { %v185_v59 = vadd.f32 %v315_v2, %v117_v46 }
  0xd6   :  { %v50_v40 = vld [vmem:[%s829_s0 + $0x120] sm:$0xff]  ;;  %v77_v41 = vld [vmem:[%s829_s0 + $0x1f8] sm:$0xff] }
  0xd7   :  { %240 = vst [vmem:[%s832_s3 + $0xd0] sm:$0xff] %v176_v29  ;;  %v145_v48 = vmul.f32 %v310_v1, %v77_v41  ;;  %v118_v50 = vmul.f32 %v310_v1, %v50_v40 }
  0xd9   :  { %v604_v55 = vadd.f32 %v315_v2, %v145_v48  ;;  %v186_v62 = vadd.f32 %v315_v2, %v118_v50 }
  0xde   :  { %v51_v44 = vld [vmem:[%s829_s0 + $0x128] sm:$0xff] }
  0xdf   :  { %241 = vst [vmem:[%s832_s3 + $0xd8] sm:$0xff] %v177_v32  ;;  %v119_v53 = vmul.f32 %v310_v1, %v51_v44 }
  0xe1   :  { %v187_v3 = vadd.f32 %v315_v2, %v119_v53 }
  0xe6   :  { %v52_v47 = vld [vmem:[%s829_s0 + $0x130] sm:$0xff] }
  0xe7   :  { %242 = vst [vmem:[%s832_s3 + $0xe0] sm:$0xff] %v178_v35  ;;  %v120_v57 = vmul.f32 %v310_v1, %v52_v47 }
  0xe9   :  { %v188_v6 = vadd.f32 %v315_v2, %v120_v57 }
  0xee   :  { %v53_v51 = vld [vmem:[%s829_s0 + $0x138] sm:$0xff] }
  0xef   :  { %243 = vst [vmem:[%s832_s3 + $0xe8] sm:$0xff] %v179_v38  ;;  %v121_v60 = vmul.f32 %v310_v1, %v53_v51 }
  0xf1   :  { %v189_v9 = vadd.f32 %v315_v2, %v121_v60 }
  0xf6   :  { %v54_v54 = vld [vmem:[%s829_s0 + $0x140] sm:$0xff] }
  0xf7   :  { %244 = vst [vmem:[%s832_s3 + $0xf0] sm:$0xff] %v180_v42  ;;  %v122_v63 = vmul.f32 %v310_v1, %v54_v54 }
  0xf9   :  { %v190_v12 = vadd.f32 %v315_v2, %v122_v63 }
  0xfe   :  { %v55_v58 = vld [vmem:[%s829_s0 + $0x148] sm:$0xff] }
  0xff   :  { %245 = vst [vmem:[%s832_s3 + $0xf8] sm:$0xff] %v181_v45  ;;  %v123_v4 = vmul.f32 %v310_v1, %v55_v58 }
 0x101   :  { %v191_v15 = vadd.f32 %v315_v2, %v123_v4 }
 0x106   :  { %v56_v61 = vld [vmem:[%s829_s0 + $0x150] sm:$0xff] }
 0x107   :  { %246 = vst [vmem:[%s832_s3 + $0x100] sm:$0xff] %v182_v49  ;;  %v124_v7 = vmul.f32 %v310_v1, %v56_v61 }
 0x109   :  { %v192_v18 = vadd.f32 %v315_v2, %v124_v7 }
 0x10e   :  { %v57_v0 = vld [vmem:[%s829_s0 + $0x158] sm:$0xff] }
 0x10f   :  { %247 = vst [vmem:[%s832_s3 + $0x108] sm:$0xff] %v183_v52  ;;  %v125_v10 = vmul.f32 %v310_v1, %v57_v0 }
 0x111   :  { %v193_v21 = vadd.f32 %v315_v2, %v125_v10 }
 0x116   :  { %v58_v5 = vld [vmem:[%s829_s0 + $0x160] sm:$0xff] }
 0x117   :  { %248 = vst [vmem:[%s832_s3 + $0x110] sm:$0xff] %v184_v56  ;;  %v126_v13 = vmul.f32 %v310_v1, %v58_v5 }
 0x119   :  { %v194_v24 = vadd.f32 %v315_v2, %v126_v13 }
 0x11e   :  { %v59_v8 = vld [vmem:[%s829_s0 + $0x168] sm:$0xff] }
 0x11f   :  { %249 = vst [vmem:[%s832_s3 + $0x118] sm:$0xff] %v185_v59  ;;  %v127_v16 = vmul.f32 %v310_v1, %v59_v8 }
 0x121   :  { %v195_v27 = vadd.f32 %v315_v2, %v127_v16 }
 0x126   :  { %v60_v11 = vld [vmem:[%s829_s0 + $0x170] sm:$0xff] }
 0x127   :  { %250 = vst [vmem:[%s832_s3 + $0x120] sm:$0xff] %v186_v62  ;;  %v128_v19 = vmul.f32 %v310_v1, %v60_v11 }
 0x129   :  { %v196_v30 = vadd.f32 %v315_v2, %v128_v19 }
 0x12e   :  { %v61_v14 = vld [vmem:[%s829_s0 + $0x178] sm:$0xff] }
 0x12f   :  { %251 = vst [vmem:[%s832_s3 + $0x128] sm:$0xff] %v187_v3  ;;  %v129_v22 = vmul.f32 %v310_v1, %v61_v14 }
 0x131   :  { %v197_v33 = vadd.f32 %v315_v2, %v129_v22 }
 0x136   :  { %v62_v17 = vld [vmem:[%s829_s0 + $0x180] sm:$0xff] }
 0x137   :  { %252 = vst [vmem:[%s832_s3 + $0x130] sm:$0xff] %v188_v6  ;;  %v130_v25 = vmul.f32 %v310_v1, %v62_v17 }
 0x139   :  { %v198_v36 = vadd.f32 %v315_v2, %v130_v25 }
 0x13e   :  { %v63_v20 = vld [vmem:[%s829_s0 + $0x188] sm:$0xff] }
 0x13f   :  { %253 = vst [vmem:[%s832_s3 + $0x138] sm:$0xff] %v189_v9  ;;  %v131_v28 = vmul.f32 %v310_v1, %v63_v20 }
 0x141   :  { %v199_v39 = vadd.f32 %v315_v2, %v131_v28 }
 0x146   :  { %v64_v23 = vld [vmem:[%s829_s0 + $0x190] sm:$0xff] }
 0x147   :  { %254 = vst [vmem:[%s832_s3 + $0x140] sm:$0xff] %v190_v12  ;;  %v132_v31 = vmul.f32 %v310_v1, %v64_v23 }
 0x149   :  { %v200_v42 = vadd.f32 %v315_v2, %v132_v31 }
 0x14e   :  { %v65_v26 = vld [vmem:[%s829_s0 + $0x198] sm:$0xff] }
 0x14f   :  { %255 = vst [vmem:[%s832_s3 + $0x148] sm:$0xff] %v191_v15  ;;  %v133_v34 = vmul.f32 %v310_v1, %v65_v26 }
 0x151   :  { %v201_v45 = vadd.f32 %v315_v2, %v133_v34 }
 0x156   :  { %v66_v29 = vld [vmem:[%s829_s0 + $0x1a0] sm:$0xff] }
 0x157   :  { %256 = vst [vmem:[%s832_s3 + $0x150] sm:$0xff] %v192_v18  ;;  %v134_v37 = vmul.f32 %v310_v1, %v66_v29 }
 0x159   :  { %v202_v48 = vadd.f32 %v315_v2, %v134_v37 }
 0x15e   :  { %v67_v32 = vld [vmem:[%s829_s0 + $0x1a8] sm:$0xff] }
 0x15f   :  { %257 = vst [vmem:[%s832_s3 + $0x158] sm:$0xff] %v193_v21  ;;  %v135_v40 = vmul.f32 %v310_v1, %v67_v32 }
 0x161   :  { %v203_v51 = vadd.f32 %v315_v2, %v135_v40 }
 0x166   :  { %v68_v35 = vld [vmem:[%s829_s0 + $0x1b0] sm:$0xff] }
 0x167   :  { %258 = vst [vmem:[%s832_s3 + $0x160] sm:$0xff] %v194_v24  ;;  %v136_v43 = vmul.f32 %v310_v1, %v68_v35 }
 0x169   :  { %v204_v54 = vadd.f32 %v315_v2, %v136_v43 }
 0x16e   :  { %v69_v38 = vld [vmem:[%s829_s0 + $0x1b8] sm:$0xff] }
 0x16f   :  { %259 = vst [vmem:[%s832_s3 + $0x168] sm:$0xff] %v195_v27  ;;  %v137_v46 = vmul.f32 %v310_v1, %v69_v38 }
 0x171   :  { %v205_v58 = vadd.f32 %v315_v2, %v137_v46 }
 0x176   :  { %v70_v41 = vld [vmem:[%s829_s0 + $0x1c0] sm:$0xff] }
 0x177   :  { %260 = vst [vmem:[%s832_s3 + $0x170] sm:$0xff] %v196_v30  ;;  %v138_v49 = vmul.f32 %v310_v1, %v70_v41 }
 0x179   :  { %v206_v61 = vadd.f32 %v315_v2, %v138_v49 }
 0x17e   :  { %v71_v44 = vld [vmem:[%s829_s0 + $0x1c8] sm:$0xff] }
 0x17f   :  { %261 = vst [vmem:[%s832_s3 + $0x178] sm:$0xff] %v197_v33  ;;  %v139_v52 = vmul.f32 %v310_v1, %v71_v44 }
 0x181   :  { %v207_v63 = vadd.f32 %v315_v2, %v139_v52 }
 0x186   :  { %v72_v47 = vld [vmem:[%s829_s0 + $0x1d0] sm:$0xff] }
 0x187   :  { %262 = vst [vmem:[%s832_s3 + $0x180] sm:$0xff] %v198_v36  ;;  %v140_v56 = vmul.f32 %v310_v1, %v72_v47 }
 0x189   :  { %v208_v3 = vadd.f32 %v315_v2, %v140_v56 }
 0x18e   :  { %v73_v50 = vld [vmem:[%s829_s0 + $0x1d8] sm:$0xff] }
 0x18f   :  { %263 = vst [vmem:[%s832_s3 + $0x188] sm:$0xff] %v199_v39  ;;  %v141_v59 = vmul.f32 %v310_v1, %v73_v50 }
 0x191   :  { %v209_v5 = vadd.f32 %v315_v2, %v141_v59 }
 0x196   :  { %v74_v53 = vld [vmem:[%s829_s0 + $0x1e0] sm:$0xff] }
 0x197   :  { %264 = vst [vmem:[%s832_s3 + $0x190] sm:$0xff] %v200_v42  ;;  %v142_v62 = vmul.f32 %v310_v1, %v74_v53 }
 0x199   :  { %v210_v6 = vadd.f32 %v315_v2, %v142_v62 }
 0x19e   :  { %v75_v57 = vld [vmem:[%s829_s0 + $0x1e8] sm:$0xff] }
 0x19f   :  { %265 = vst [vmem:[%s832_s3 + $0x198] sm:$0xff] %v201_v45  ;;  %v143_v0 = vmul.f32 %v310_v1, %v75_v57 }
 0x1a1   :  { %v211_v7 = vadd.f32 %v315_v2, %v143_v0 }
 0x1a6   :  { %v76_v60 = vld [vmem:[%s829_s0 + $0x1f0] sm:$0xff] }
 0x1a7   :  { %266 = vst [vmem:[%s832_s3 + $0x1a0] sm:$0xff] %v202_v48  ;;  %v144_v4 = vmul.f32 %v310_v1, %v76_v60 }
 0x1a8   :  { %267 = vst [vmem:[%s832_s3 + $0x1a8] sm:$0xff] %v203_v51 }
 0x1a9   :  { %268 = vst [vmem:[%s832_s3 + $0x1b0] sm:$0xff] %v204_v54  ;;  %v212_v1 = vadd.f32 %v315_v2, %v144_v4 }
 0x1aa   :  { %269 = vst [vmem:[%s832_s3 + $0x1b8] sm:$0xff] %v205_v58 }
 0x1ab   :  { %270 = vst [vmem:[%s832_s3 + $0x1c0] sm:$0xff] %v206_v61 }
 0x1ac   :  { %271 = vst [vmem:[%s832_s3 + $0x1c8] sm:$0xff] %v207_v63 }
 0x1ad   :  { %272 = vst [vmem:[%s832_s3 + $0x1d0] sm:$0xff] %v208_v3 }
 0x1ae   :  { %273 = vst [vmem:[%s832_s3 + $0x1d8] sm:$0xff] %v209_v5 }
 0x1af   :  { %274 = vst [vmem:[%s832_s3 + $0x1e0] sm:$0xff] %v210_v6 }
 0x1b0   :  { %275 = vst [vmem:[%s832_s3 + $0x1e8] sm:$0xff] %v211_v7 }
 0x1b1   :  { %276 = vst [vmem:[%s832_s3 + $0x1f0] sm:$0xff] %v212_v1 }
 0x1b2   :  { %277 = vst [vmem:[%s832_s3 + $0x1f8] sm:$0xff] %v604_v55 }

// kernel: relu_conv_bn.2
= control target key start
LH: loop header
LB: loop body
LE: loop exit
PB: predicated region body
PF: predicated region fallthrough
CT: control target
= control target key end

     0   :  { %vm362_vm0 = vcmask 1041408   ;;  %vm265_vm1 = vcmask 293888   ;;  %s1698_s1 = inlined_call_operand.vmem [shape: bf16[36,128], index: 1, kind: input, shape index: {}]   ;;  %s1699_s0 = inlined_call_operand.vmem [shape: bf16[512,36], index: 0, kind: input, shape index: {}]   ;;  %s1700_s2 = inlined_call_operand.vmem [shape: f32[512,128], index: 2, kind: output, shape index: {0}]   ;;  %s1701_s3 = inlined_call_operand.vmem [shape: f32[1,128], index: 3, kind: output, shape index: {1}]   ;;  %s1702_s4 = inlined_call_operand.vmem [shape: f32[1,128], index: 4, kind: output, shape index: {2}]  }
   0x1   :  { %v89_v0 = vld [vmem:[%s1698_s1 + $0x10] sm:$0x3]  ;;  %v1020_v4 = vld [vmem:[%s1698_s1 + $0x8] sm:$0xff]  ;;  %v1019_v5 = vld [vmem:[%s1698_s1] sm:$0xff] }
   0x2   :  { %v259_v1 = vunpack.c.l.b16 %v89_v0  ;;  %v987_v6 = vld [vmem:[%s1699_s0] sm:$0xff]  ;;  %v988_v8 = vld [vmem:[%s1699_s0 + $0x8] sm:$0xff]  ;;  %v989_v11 = vld [vmem:[%s1699_s0 + $0x10] sm:$0xff] }
   0x3   :  { %v995_v7 = vld [vmem:[%s1699_s0 + $0x40] sm:$0xff]  ;;  %v996_v9 = vld [vmem:[%s1699_s0 + $0x48] sm:$0xff]  ;;  %v997_v12 = vld [vmem:[%s1699_s0 + $0x50] sm:$0xff] }
   0x4   :  { %v262_v2 = vpack.c.b16 %v259_v1, %v259_v1  ;;  %v1003_v10 = vld [vmem:[%s1699_s0 + $0x80] sm:$0xff]  ;;  %v1004_v13 = vld [vmem:[%s1699_s0 + $0x88] sm:$0xff]  ;;  %v990_v14 = vld [vmem:[%s1699_s0 + $0x18] sm:$0xff] }
   0x5   :  { %v998_v15 = vld [vmem:[%s1699_s0 + $0x58] sm:$0xff]  ;;  %v1005_v16 = vld [vmem:[%s1699_s0 + $0x90] sm:$0xff]  ;;  %v1011_v17 = vld [vmem:[%s1699_s0 + $0xc0] sm:$0xff] }
   0x6   :  { %v364_v3 = vsel %vm362_vm0, %v262_v2, 0  ;;  %v991_v18 = vld [vmem:[%s1699_s0 + $0x20] sm:$0xff]  ;;  %v1006_v20 = vld [vmem:[%s1699_s0 + $0x98] sm:$0xff]  ;;  %v1012_v21 = vld [vmem:[%s1699_s0 + $0xc8] sm:$0xff] }
   0x7   :  { %371 = vmatpush.bf16.msra.mxu0 %v364_v3  ;;  %1021 = vmatpush.bf16.msra.mxu1 %v364_v3  ;;  %v999_v19 = vld [vmem:[%s1699_s0 + $0x60] sm:$0xff]  ;;  %v992_v22 = vld [vmem:[%s1699_s0 + $0x28] sm:$0xff]  ;;  %v1013_v25 = vld [vmem:[%s1699_s0 + $0xd0] sm:$0xff] }
   0x8   :  { %1022 = vmatpush.bf16.msra.mxu2 %v364_v3  ;;  %1023 = vmatpush.bf16.msra.mxu3 %v364_v3  ;;  %v1000_v23 = vld [vmem:[%s1699_s0 + $0x68] sm:$0xff]  ;;  %v1007_v24 = vld [vmem:[%s1699_s0 + $0xa0] sm:$0xff]  ;;  %v993_v26 = vld [vmem:[%s1699_s0 + $0x30] sm:$0xff] }
   0x9   :  { %v1001_v27 = vld [vmem:[%s1699_s0 + $0x70] sm:$0xff]  ;;  %v1008_v28 = vld [vmem:[%s1699_s0 + $0xa8] sm:$0xff]  ;;  %v1014_v29 = vld [vmem:[%s1699_s0 + $0xd8] sm:$0xff] }
   0xa   :  { %v994_v30 = vld [vmem:[%s1699_s0 + $0x38] sm:$0xff]  ;;  %v1009_v32 = vld [vmem:[%s1699_s0 + $0xb0] sm:$0xff]  ;;  %v1015_v33 = vld [vmem:[%s1699_s0 + $0xe0] sm:$0xff] }
   0xb   :  { %372 = vmatpush.bf16.msra.mxu0 %v1020_v4  ;;  %1024 = vmatpush.bf16.msra.mxu1 %v1020_v4  ;;  %v1002_v31 = vld [vmem:[%s1699_s0 + $0x78] sm:$0xff]  ;;  %v1016_v37 = vld [vmem:[%s1699_s0 + $0xe8] sm:$0xff]  ;;  %v1017_v49 = vld [vmem:[%s1699_s0 + $0xf0] sm:$0xff] }
   0xc   :  { %1025 = vmatpush.bf16.msra.mxu2 %v1020_v4  ;;  %1026 = vmatpush.bf16.msra.mxu3 %v1020_v4  ;;  %v1010_v36 = vld [vmem:[%s1699_s0 + $0xb8] sm:$0xff] }
   0xd   :  { %v1018_v62 = vld [vmem:[%s1699_s0 + $0xf8] sm:$0xff] }
   0xf   :  { %373 = vmatpush.bf16.msra.mxu0 %v1019_v5  ;;  %1027 = vmatpush.bf16.msra.mxu1 %v1019_v5 }
  0x10   :  { %1028 = vmatpush.bf16.msra.mxu2 %v1019_v5  ;;  %1029 = vmatpush.bf16.msra.mxu3 %v1019_v5 }
  0x12   :  { %955 = vmatmul.msk.bf16.vlgmr.msra.gmra.mxu0 %vm265_vm1, %v987_v6  ;;  %963 = vmatmul.msk.bf16.vlgmr.msra.gmra.mxu1 %vm265_vm1, %v995_v7 }
  0x13   :  { %971 = vmatmul.msk.bf16.vlgmr.msra.gmra.mxu2 %vm265_vm1, %v1003_v10  ;;  %979 = vmatmul.msk.bf16.vlgmr.msra.gmra.mxu3 %vm265_vm1, %v1011_v17 }
  0x22   :  { %956 = vmatmul.msk.bf16.gmra.mxu0 %vm265_vm1, %v988_v8  ;;  %964 = vmatmul.msk.bf16.gmra.mxu1 %vm265_vm1, %v996_v9 }
  0x23   :  { %972 = vmatmul.msk.bf16.gmra.mxu2 %vm265_vm1, %v1004_v13  ;;  %980 = vmatmul.msk.bf16.gmra.mxu3 %vm265_vm1, %v1012_v21 }
  0x32   :  { %957 = vmatmul.msk.bf16.gmra.mxu0 %vm265_vm1, %v989_v11  ;;  %965 = vmatmul.msk.bf16.gmra.mxu1 %vm265_vm1, %v997_v12 }
  0x33   :  { %973 = vmatmul.msk.bf16.gmra.mxu2 %vm265_vm1, %v1005_v16  ;;  %981 = vmatmul.msk.bf16.gmra.mxu3 %vm265_vm1, %v1013_v25 }
  0x42   :  { %958 = vmatmul.msk.bf16.gmra.mxu0 %vm265_vm1, %v990_v14  ;;  %966 = vmatmul.msk.bf16.gmra.mxu1 %vm265_vm1, %v998_v15 }
  0x43   :  { %974 = vmatmul.msk.bf16.gmra.mxu2 %vm265_vm1, %v1006_v20  ;;  %982 = vmatmul.msk.bf16.gmra.mxu3 %vm265_vm1, %v1014_v29 }
  0x52   :  { %959 = vmatmul.msk.bf16.gmra.mxu0 %vm265_vm1, %v991_v18  ;;  %967 = vmatmul.msk.bf16.gmra.mxu1 %vm265_vm1, %v999_v19 }
  0x53   :  { %975 = vmatmul.msk.bf16.gmra.mxu2 %vm265_vm1, %v1007_v24  ;;  %983 = vmatmul.msk.bf16.gmra.mxu3 %vm265_vm1, %v1015_v33 }
  0x62   :  { %960 = vmatmul.msk.bf16.gmra.mxu0 %vm265_vm1, %v992_v22  ;;  %968 = vmatmul.msk.bf16.gmra.mxu1 %vm265_vm1, %v1000_v23 }
  0x63   :  { %976 = vmatmul.msk.bf16.gmra.mxu2 %vm265_vm1, %v1008_v28  ;;  %984 = vmatmul.msk.bf16.gmra.mxu3 %vm265_vm1, %v1016_v37 }
  0x72   :  { %961 = vmatmul.msk.bf16.gmra.mxu0 %vm265_vm1, %v993_v26  ;;  %969 = vmatmul.msk.bf16.gmra.mxu1 %vm265_vm1, %v1001_v27 }
  0x73   :  { %977 = vmatmul.msk.bf16.gmra.mxu2 %vm265_vm1, %v1009_v32  ;;  %985 = vmatmul.msk.bf16.gmra.mxu3 %vm265_vm1, %v1017_v49 }
  0x82   :  { %962 = vmatmul.msk.bf16.gmra.mxu0 %vm265_vm1, %v994_v30  ;;  %970 = vmatmul.msk.bf16.gmra.mxu1 %vm265_vm1, %v1002_v31 }
  0x83   :  { %978 = vmatmul.msk.bf16.gmra.mxu2 %vm265_vm1, %v1010_v36  ;;  %986 = vmatmul.msk.bf16.gmra.mxu3 %vm265_vm1, %v1018_v62 }
  0x8f   :  { %v375_v34 = vpop.f32.mrf.mxu0  ;;  %v1178_v35 = vpop.f32.mrf.mxu1 }
  0x90   :  { %535 = vst [vmem:[%s1700_s2] sm:$0xff] %v375_v34  ;;  %v672_v40 = vmul.f32 %v375_v34, %v375_v34 }
  0x91   :  { %551 = vst [vmem:[%s1700_s2 + $0x80] sm:$0xff] %v1178_v35 }
  0x96   :  { %v1222_v54 = vpop.f32.mrf.mxu2  ;;  %v1292_v8 = vpop.f32.mrf.mxu3 }
  0x97   :  { %v377_v38 = vpop.f32.mrf.mxu0  ;;  %v1195_v39 = vpop.f32.mrf.mxu1  ;;  %567 = vst [vmem:[%s1700_s2 + $0x100] sm:$0xff] %v1222_v54 }
  0x98   :  { %536 = vst [vmem:[%s1700_s2 + $0x8] sm:$0xff] %v377_v38  ;;  %v600_v41 = vadd.f32 %v377_v38, %v375_v34  ;;  %v673_v42 = vmul.f32 %v377_v38, %v377_v38 }
  0x99   :  { %552 = vst [vmem:[%s1700_s2 + $0x88] sm:$0xff] %v1195_v39 }
  0x9a   :  { %v736_v43 = vadd.f32 %v673_v42, %v672_v40  ;;  %583 = vst [vmem:[%s1700_s2 + $0x180] sm:$0xff] %v1292_v8 }
  0x9e   :  { %v1239_v60 = vpop.f32.mrf.mxu2  ;;  %v1313_v12 = vpop.f32.mrf.mxu3 }
  0x9f   :  { %v380_v44 = vpop.f32.mrf.mxu0  ;;  %v1204_v45 = vpop.f32.mrf.mxu1  ;;  %568 = vst [vmem:[%s1700_s2 + $0x108] sm:$0xff] %v1239_v60 }
  0xa0   :  { %537 = vst [vmem:[%s1700_s2 + $0x10] sm:$0xff] %v380_v44  ;;  %v601_v46 = vadd.f32 %v600_v41, %v380_v44  ;;  %v674_v47 = vmul.f32 %v380_v44, %v380_v44 }
  0xa1   :  { %553 = vst [vmem:[%s1700_s2 + $0x90] sm:$0xff] %v1204_v45 }
  0xa2   :  { %v737_v48 = vadd.f32 %v736_v43, %v674_v47  ;;  %584 = vst [vmem:[%s1700_s2 + $0x188] sm:$0xff] %v1313_v12 }
  0xa6   :  { %v1260_v1 = vpop.f32.mrf.mxu2  ;;  %v1334_v16 = vpop.f32.mrf.mxu3 }
  0xa7   :  { %v382_v50 = vpop.f32.mrf.mxu0  ;;  %v1217_v51 = vpop.f32.mrf.mxu1  ;;  %569 = vst [vmem:[%s1700_s2 + $0x110] sm:$0xff] %v1260_v1 }
  0xa8   :  { %538 = vst [vmem:[%s1700_s2 + $0x18] sm:$0xff] %v382_v50  ;;  %v602_v52 = vadd.f32 %v601_v46, %v382_v50  ;;  %v675_v53 = vmul.f32 %v382_v50, %v382_v50 }
  0xa9   :  { %554 = vst [vmem:[%s1700_s2 + $0x98] sm:$0xff] %v1217_v51 }
  0xaa   :  { %v738_v55 = vadd.f32 %v737_v48, %v675_v53  ;;  %585 = vst [vmem:[%s1700_s2 + $0x190] sm:$0xff] %v1334_v16 }
  0xae   :  { %v1275_v4 = vpop.f32.mrf.mxu2  ;;  %v1355_v20 = vpop.f32.mrf.mxu3 }
  0xaf   :  { %v385_v56 = vpop.f32.mrf.mxu0  ;;  %v1232_v57 = vpop.f32.mrf.mxu1  ;;  %570 = vst [vmem:[%s1700_s2 + $0x118] sm:$0xff] %v1275_v4 }
  0xb0   :  { %539 = vst [vmem:[%s1700_s2 + $0x20] sm:$0xff] %v385_v56  ;;  %v1237_v58 = vadd.f32 %v602_v52, %v385_v56  ;;  %v676_v59 = vmul.f32 %v385_v56, %v385_v56 }
  0xb1   :  { %555 = vst [vmem:[%s1700_s2 + $0xa0] sm:$0xff] %v1232_v57 }
  0xb2   :  { %v1245_v61 = vadd.f32 %v738_v55, %v676_v59  ;;  %586 = vst [vmem:[%s1700_s2 + $0x198] sm:$0xff] %v1355_v20 }
  0xb6   :  { %v1290_v7 = vpop.f32.mrf.mxu2  ;;  %v1376_v24 = vpop.f32.mrf.mxu3 }
  0xb7   :  { %v387_v63 = vpop.f32.mrf.mxu0  ;;  %v1255_v0 = vpop.f32.mrf.mxu1  ;;  %571 = vst [vmem:[%s1700_s2 + $0x120] sm:$0xff] %v1290_v7 }
  0xb8   :  { %540 = vst [vmem:[%s1700_s2 + $0x28] sm:$0xff] %v387_v63  ;;  %v677_v29 = vmul.f32 %v387_v63, %v387_v63  ;;  %v604_v30 = vadd.f32 %v1237_v58, %v387_v63 }
  0xb9   :  { %556 = vst [vmem:[%s1700_s2 + $0xa8] sm:$0xff] %v1255_v0 }
  0xba   :  { %587 = vst [vmem:[%s1700_s2 + $0x1a0] sm:$0xff] %v1376_v24  ;;  %v740_v32 = vadd.f32 %v1245_v61, %v677_v29 }
  0xbe   :  { %v1311_v11 = vpop.f32.mrf.mxu2  ;;  %v1397_v28 = vpop.f32.mrf.mxu3 }
  0xbf   :  { %v390_v2 = vpop.f32.mrf.mxu0  ;;  %v1270_v3 = vpop.f32.mrf.mxu1  ;;  %572 = vst [vmem:[%s1700_s2 + $0x128] sm:$0xff] %v1311_v11 }
  0xc0   :  { %541 = vst [vmem:[%s1700_s2 + $0x30] sm:$0xff] %v390_v2  ;;  %v678_v31 = vmul.f32 %v390_v2, %v390_v2  ;;  %v605_v33 = vadd.f32 %v604_v30, %v390_v2 }
  0xc1   :  { %557 = vst [vmem:[%s1700_s2 + $0xb0] sm:$0xff] %v1270_v3 }
  0xc2   :  { %588 = vst [vmem:[%s1700_s2 + $0x1a8] sm:$0xff] %v1397_v28  ;;  %v741_v38 = vadd.f32 %v740_v32, %v678_v31 }
  0xc6   :  { %v1332_v15 = vpop.f32.mrf.mxu2  ;;  %v1420_v43 = vpop.f32.mrf.mxu3 }
  0xc7   :  { %v392_v5 = vpop.f32.mrf.mxu0  ;;  %v1285_v6 = vpop.f32.mrf.mxu1  ;;  %573 = vst [vmem:[%s1700_s2 + $0x130] sm:$0xff] %v1332_v15 }
  0xc8   :  { %542 = vst [vmem:[%s1700_s2 + $0x38] sm:$0xff] %v392_v5  ;;  %v679_v34 = vmul.f32 %v392_v5, %v392_v5  ;;  %v606_v40 = vadd.f32 %v605_v33, %v392_v5 }
  0xc9   :  { %558 = vst [vmem:[%s1700_s2 + $0xb8] sm:$0xff] %v1285_v6 }
  0xca   :  { %v742_v44 = vadd.f32 %v741_v38, %v679_v34  ;;  %589 = vst [vmem:[%s1700_s2 + $0x1b0] sm:$0xff] %v1420_v43 }
  0xce   :  { %v1353_v19 = vpop.f32.mrf.mxu2  ;;  %v1441_v2 = vpop.f32.mrf.mxu3 }
  0xcf   :  { %v395_v9 = vpop.f32.mrf.mxu0  ;;  %v1306_v10 = vpop.f32.mrf.mxu1  ;;  %574 = vst [vmem:[%s1700_s2 + $0x138] sm:$0xff] %v1353_v19 }
  0xd0   :  { %543 = vst [vmem:[%s1700_s2 + $0x40] sm:$0xff] %v395_v9  ;;  %v680_v41 = vmul.f32 %v395_v9, %v395_v9  ;;  %v607_v46 = vadd.f32 %v606_v40, %v395_v9 }
  0xd1   :  { %559 = vst [vmem:[%s1700_s2 + $0xc0] sm:$0xff] %v1306_v10 }
  0xd2   :  { %v743_v48 = vadd.f32 %v742_v44, %v680_v41  ;;  %590 = vst [vmem:[%s1700_s2 + $0x1b8] sm:$0xff] %v1441_v2 }
  0xd6   :  { %v1374_v23 = vpop.f32.mrf.mxu2  ;;  %v1462_v41 = vpop.f32.mrf.mxu3 }
  0xd7   :  { %v397_v13 = vpop.f32.mrf.mxu0  ;;  %v1327_v14 = vpop.f32.mrf.mxu1  ;;  %575 = vst [vmem:[%s1700_s2 + $0x140] sm:$0xff] %v1374_v23 }
  0xd8   :  { %544 = vst [vmem:[%s1700_s2 + $0x48] sm:$0xff] %v397_v13  ;;  %v681_v47 = vmul.f32 %v397_v13, %v397_v13  ;;  %v608_v49 = vadd.f32 %v607_v46, %v397_v13 }
  0xd9   :  { %560 = vst [vmem:[%s1700_s2 + $0xc8] sm:$0xff] %v1327_v14 }
  0xda   :  { %v744_v52 = vadd.f32 %v743_v48, %v681_v47  ;;  %591 = vst [vmem:[%s1700_s2 + $0x1c0] sm:$0xff] %v1462_v41  ;;  %v689_v47 = vmul.f32 %v1195_v39, %v1195_v39 }
  0xde   :  { %v1395_v27 = vpop.f32.mrf.mxu2 }
  0xdf   :  { %v400_v17 = vpop.f32.mrf.mxu0  ;;  %v1348_v18 = vpop.f32.mrf.mxu1  ;;  %576 = vst [vmem:[%s1700_s2 + $0x148] sm:$0xff] %v1395_v27 }
  0xe0   :  { %545 = vst [vmem:[%s1700_s2 + $0x50] sm:$0xff] %v400_v17  ;;  %v682_v50 = vmul.f32 %v400_v17, %v400_v17  ;;  %v609_v53 = vadd.f32 %v608_v49, %v400_v17 }
  0xe1   :  { %561 = vst [vmem:[%s1700_s2 + $0xd0] sm:$0xff] %v1348_v18 }
  0xe2   :  { %v745_v59 = vadd.f32 %v744_v52, %v682_v50 }
  0xe6   :  { %v1418_v42 = vpop.f32.mrf.mxu2 }
  0xe7   :  { %v402_v21 = vpop.f32.mrf.mxu0  ;;  %v1369_v22 = vpop.f32.mrf.mxu1  ;;  %577 = vst [vmem:[%s1700_s2 + $0x150] sm:$0xff] %v1418_v42 }
  0xe8   :  { %546 = vst [vmem:[%s1700_s2 + $0x58] sm:$0xff] %v402_v21  ;;  %v683_v55 = vmul.f32 %v402_v21, %v402_v21  ;;  %v610_v61 = vadd.f32 %v609_v53, %v402_v21  ;;  %v691_v53 = vmul.f32 %v1217_v51, %v1217_v51 }
  0xe9   :  { %562 = vst [vmem:[%s1700_s2 + $0xd8] sm:$0xff] %v1369_v22 }
  0xea   :  { %v746_v5 = vadd.f32 %v745_v59, %v683_v55 }
  0xee   :  { %v1439_v63 = vpop.f32.mrf.mxu2 }
  0xef   :  { %v405_v25 = vpop.f32.mrf.mxu0  ;;  %v1390_v26 = vpop.f32.mrf.mxu1  ;;  %578 = vst [vmem:[%s1700_s2 + $0x158] sm:$0xff] %v1439_v63 }
  0xf0   :  { %547 = vst [vmem:[%s1700_s2 + $0x60] sm:$0xff] %v405_v25  ;;  %v684_v62 = vmul.f32 %v405_v25, %v405_v25  ;;  %v611_v9 = vadd.f32 %v610_v61, %v405_v25  ;;  %v1490_v61 = vpop.f32.mrf.mxu3 }
  0xf1   :  { %563 = vst [vmem:[%s1700_s2 + $0xe0] sm:$0xff] %v1390_v26 }
  0xf2   :  { %v747_v17 = vadd.f32 %v746_v5, %v684_v62  ;;  %592 = vst [vmem:[%s1700_s2 + $0x1c8] sm:$0xff] %v1490_v61 }
  0xf6   :  { %v1460_v40 = vpop.f32.mrf.mxu2 }
  0xf7   :  { %v407_v36 = vpop.f32.mrf.mxu0  ;;  %v1413_v37 = vpop.f32.mrf.mxu1  ;;  %579 = vst [vmem:[%s1700_s2 + $0x160] sm:$0xff] %v1460_v40 }
  0xf8   :  { %548 = vst [vmem:[%s1700_s2 + $0x68] sm:$0xff] %v407_v36  ;;  %v685_v13 = vmul.f32 %v407_v36, %v407_v36  ;;  %v612_v21 = vadd.f32 %v611_v9, %v407_v36  ;;  %v688_v36 = vmul.f32 %v1178_v35, %v1178_v35 }
  0xf9   :  { %564 = vst [vmem:[%s1700_s2 + $0xe8] sm:$0xff] %v1413_v37 }
  0xfa   :  { %v748_v30 = vadd.f32 %v747_v17, %v685_v13  ;;  %v694_v13 = vmul.f32 %v1270_v3, %v1270_v3 }
  0xfe   :  { %v1488_v59 = vpop.f32.mrf.mxu2 }
  0xff   :  { %v410_v56 = vpop.f32.mrf.mxu0  ;;  %v1434_v58 = vpop.f32.mrf.mxu1  ;;  %580 = vst [vmem:[%s1700_s2 + $0x168] sm:$0xff] %v1488_v59 }
 0x100   :  { %549 = vst [vmem:[%s1700_s2 + $0x70] sm:$0xff] %v410_v56  ;;  %v686_v29 = vmul.f32 %v410_v56, %v410_v56  ;;  %v613_v31 = vadd.f32 %v612_v21, %v410_v56 }
 0x101   :  { %565 = vst [vmem:[%s1700_s2 + $0xf0] sm:$0xff] %v1434_v58 }
 0x102   :  { %v749_v25 = vadd.f32 %v748_v30, %v686_v29 }
 0x107   :  { %v412_v32 = vpop.f32.mrf.mxu0  ;;  %v1455_v33 = vpop.f32.mrf.mxu1 }
 0x108   :  { %550 = vst [vmem:[%s1700_s2 + $0x78] sm:$0xff] %v412_v32  ;;  %v614_v34 = vadd.f32 %v613_v31, %v412_v32  ;;  %v687_v38 = vmul.f32 %v412_v32, %v412_v32  ;;  %v1512_v31 = vpop.f32.mrf.mxu2  ;;  %v1514_v32 = vpop.f32.mrf.mxu3 }
 0x109   :  { %566 = vst [vmem:[%s1700_s2 + $0xf8] sm:$0xff] %v1455_v33 }
 0x10a   :  { %v615_v44 = vadd.f32 %v614_v34, %v1178_v35  ;;  %v750_v46 = vadd.f32 %v749_v25, %v687_v38  ;;  %v690_v35 = vmul.f32 %v1204_v45, %v1204_v45  ;;  %581 = vst [vmem:[%s1700_s2 + $0x170] sm:$0xff] %v1512_v31 }
 0x10b   :  { %593 = vst [vmem:[%s1700_s2 + $0x1d0] sm:$0xff] %v1514_v32 }
 0x10c   :  { %v616_v48 = vadd.f32 %v615_v44, %v1195_v39  ;;  %v751_v49 = vadd.f32 %v750_v46, %v688_v36  ;;  %v692_v39 = vmul.f32 %v1232_v57, %v1232_v57  ;;  %v698_v36 = vmul.f32 %v1348_v18, %v1348_v18 }
 0x10e   :  { %v617_v50 = vadd.f32 %v616_v48, %v1204_v45  ;;  %v752_v52 = vadd.f32 %v751_v49, %v689_v47 }
 0x110   :  { %v618_v55 = vadd.f32 %v617_v50, %v1217_v51  ;;  %v753_v56 = vadd.f32 %v752_v52, %v690_v35  ;;  %v693_v51 = vmul.f32 %v1255_v0, %v1255_v0  ;;  %v1536_v49 = vpop.f32.mrf.mxu2  ;;  %v1538_v35 = vpop.f32.mrf.mxu3 }
 0x111   :  { %582 = vst [vmem:[%s1700_s2 + $0x178] sm:$0xff] %v1536_v49 }
 0x112   :  { %v619_v45 = vadd.f32 %v618_v55, %v1232_v57  ;;  %v754_v62 = vadd.f32 %v753_v56, %v691_v53  ;;  %v695_v57 = vmul.f32 %v1285_v6, %v1285_v6  ;;  %594 = vst [vmem:[%s1700_s2 + $0x1d8] sm:$0xff] %v1538_v35  ;;  %v701_v53 = vmul.f32 %v1413_v37, %v1413_v37 }
 0x114   :  { %v620_v5 = vadd.f32 %v619_v45, %v1255_v0  ;;  %v755_v9 = vadd.f32 %v754_v62, %v692_v39  ;;  %v696_v0 = vmul.f32 %v1306_v10, %v1306_v10  ;;  %v702_v39 = vmul.f32 %v1434_v58, %v1434_v58 }
 0x115   :  { %v703_v62 = vmul.f32 %v1455_v33, %v1455_v33 }
 0x116   :  { %v756_v17 = vadd.f32 %v755_v9, %v693_v51  ;;  %v621_v21 = vadd.f32 %v620_v5, %v1270_v3 }
 0x118   :  { %v622_v29 = vadd.f32 %v621_v21, %v1285_v6  ;;  %v757_v30 = vadd.f32 %v756_v17, %v694_v13  ;;  %v697_v6 = vmul.f32 %v1327_v14, %v1327_v14  ;;  %v1560_v51 = vpop.f32.mrf.mxu3 }
 0x119   :  { %595 = vst [vmem:[%s1700_s2 + $0x1e0] sm:$0xff] %v1560_v51 }
 0x11a   :  { %v623_v3 = vadd.f32 %v622_v29, %v1306_v10  ;;  %v758_v25 = vadd.f32 %v757_v30, %v695_v57  ;;  %v699_v10 = vmul.f32 %v1369_v22, %v1369_v22  ;;  %v707_v29 = vmul.f32 %v1275_v4, %v1275_v4 }
 0x11c   :  { %v624_v34 = vadd.f32 %v623_v3, %v1327_v14  ;;  %v759_v38 = vadd.f32 %v758_v25, %v696_v0  ;;  %v709_v25 = vmul.f32 %v1311_v11, %v1311_v11 }
 0x11e   :  { %v625_v44 = vadd.f32 %v624_v34, %v1348_v18  ;;  %v760_v46 = vadd.f32 %v759_v38, %v697_v6  ;;  %v700_v18 = vmul.f32 %v1390_v26, %v1390_v26  ;;  %v710_v34 = vmul.f32 %v1332_v15, %v1332_v15 }
 0x120   :  { %v626_v47 = vadd.f32 %v625_v44, %v1369_v22  ;;  %v761_v48 = vadd.f32 %v760_v46, %v698_v36  ;;  %v711_v44 = vmul.f32 %v1353_v19, %v1353_v19 }
 0x122   :  { %v627_v14 = vadd.f32 %v626_v47, %v1390_v26  ;;  %v762_v50 = vadd.f32 %v761_v48, %v699_v10 }
 0x124   :  { %v763_v22 = vadd.f32 %v762_v50, %v700_v18  ;;  %v628_v52 = vadd.f32 %v627_v14, %v1413_v37  ;;  %v704_v37 = vmul.f32 %v1222_v54, %v1222_v54  ;;  %v714_v18 = vmul.f32 %v1418_v42, %v1418_v42 }
 0x126   :  { %v764_v55 = vadd.f32 %v763_v22, %v701_v53  ;;  %v629_v56 = vadd.f32 %v628_v52, %v1434_v58  ;;  %v705_v58 = vmul.f32 %v1239_v60, %v1239_v60  ;;  %v715_v53 = vmul.f32 %v1439_v63, %v1439_v63 }
 0x128   :  { %v765_v45 = vadd.f32 %v764_v55, %v702_v39  ;;  %v630_v26 = vadd.f32 %v629_v56, %v1455_v33  ;;  %v706_v33 = vmul.f32 %v1260_v1, %v1260_v1 }
 0x12a   :  { %v631_v5 = vadd.f32 %v630_v26, %v1222_v54  ;;  %v766_v9 = vadd.f32 %v765_v45, %v703_v62  ;;  %v1578_v54 = vpop.f32.mrf.mxu3 }
 0x12b   :  { %596 = vst [vmem:[%s1700_s2 + $0x1e8] sm:$0xff] %v1578_v54 }
 0x12c   :  { %v632_v13 = vadd.f32 %v631_v5, %v1239_v60  ;;  %v767_v17 = vadd.f32 %v766_v9, %v704_v37  ;;  %v708_v60 = vmul.f32 %v1290_v7, %v1290_v7  ;;  %v718_v37 = vmul.f32 %v1512_v31, %v1512_v31 }
 0x12e   :  { %v633_v21 = vadd.f32 %v632_v13, %v1260_v1  ;;  %v768_v57 = vadd.f32 %v767_v17, %v705_v58  ;;  %v719_v58 = vmul.f32 %v1536_v49, %v1536_v49  ;;  %v1031_v13 = vmov 0.0  }
 0x12f   :  { %19 = vst [vmem:[%s1701_s3] sm:$0x1] %v1031_v13 }
 0x130   :  { %v634_v30 = vadd.f32 %v633_v21, %v1275_v4  ;;  %v769_v0 = vadd.f32 %v768_v57, %v706_v33  ;;  %20 = vst [vmem:[%s1702_s4] sm:$0x1] %v1031_v13  ;;  %v722_v21 = vmul.f32 %v1334_v16, %v1334_v16 }
 0x132   :  { %v635_v3 = vadd.f32 %v634_v30, %v1290_v7  ;;  %v770_v1 = vadd.f32 %v769_v0, %v707_v29  ;;  %v1596_v7 = vpop.f32.mrf.mxu3 }
 0x133   :  { %597 = vst [vmem:[%s1700_s2 + $0x1f0] sm:$0xff] %v1596_v7 }
 0x134   :  { %v636_v6 = vadd.f32 %v635_v3, %v1311_v11  ;;  %v771_v4 = vadd.f32 %v770_v1, %v708_v60  ;;  %v712_v11 = vmul.f32 %v1374_v23, %v1374_v23  ;;  %v724_v60 = vmul.f32 %v1376_v24, %v1376_v24 }
 0x136   :  { %v772_v38 = vadd.f32 %v771_v4, %v709_v25  ;;  %v637_v36 = vadd.f32 %v636_v6, %v1332_v15  ;;  %v713_v15 = vmul.f32 %v1395_v27, %v1395_v27 }
 0x138   :  { %v638_v46 = vadd.f32 %v637_v36, %v1353_v19  ;;  %v773_v10 = vadd.f32 %v772_v38, %v710_v34 }
 0x13a   :  { %v639_v47 = vadd.f32 %v638_v46, %v1374_v23  ;;  %v774_v48 = vadd.f32 %v773_v10, %v711_v44  ;;  %v1614_v23 = vpop.f32.mrf.mxu3 }
 0x13b   :  { %598 = vst [vmem:[%s1700_s2 + $0x1f8] sm:$0xff] %v1614_v23 }
 0x13c   :  { %v640_v14 = vadd.f32 %v639_v47, %v1395_v27  ;;  %v775_v19 = vadd.f32 %v774_v48, %v712_v11 }
 0x13e   :  { %v641_v50 = vadd.f32 %v640_v14, %v1418_v42  ;;  %v776_v22 = vadd.f32 %v775_v19, %v713_v15  ;;  %v716_v42 = vmul.f32 %v1460_v40, %v1460_v40  ;;  %v731_v15 = vmul.f32 %v1538_v35, %v1538_v35 }
 0x140   :  { %v642_v52 = vadd.f32 %v641_v50, %v1439_v63  ;;  %v777_v55 = vadd.f32 %v776_v22, %v714_v18  ;;  %v717_v63 = vmul.f32 %v1488_v59, %v1488_v59  ;;  %v732_v18 = vmul.f32 %v1560_v51, %v1560_v51 }
 0x141   :  { %v733_v22 = vmul.f32 %v1578_v54, %v1578_v54 }
 0x142   :  { %v778_v27 = vadd.f32 %v777_v55, %v715_v53  ;;  %v643_v56 = vadd.f32 %v642_v52, %v1460_v40  ;;  %v720_v40 = vmul.f32 %v1292_v8, %v1292_v8  ;;  %v734_v53 = vmul.f32 %v1596_v7, %v1596_v7 }
 0x144   :  { %v779_v39 = vadd.f32 %v778_v27, %v716_v42  ;;  %v644_v45 = vadd.f32 %v643_v56, %v1488_v59  ;;  %v735_v27 = vmul.f32 %v1614_v23, %v1614_v23 }
 0x146   :  { %v780_v26 = vadd.f32 %v779_v39, %v717_v63  ;;  %v645_v62 = vadd.f32 %v644_v45, %v1512_v31  ;;  %v721_v31 = vmul.f32 %v1313_v12, %v1313_v12 }
 0x148   :  { %v781_v5 = vadd.f32 %v780_v26, %v718_v37  ;;  %v646_v9 = vadd.f32 %v645_v62, %v1536_v49 }
 0x14a   :  { %v647_v59 = vadd.f32 %v646_v9, %v1292_v8  ;;  %v782_v17 = vadd.f32 %v781_v5, %v719_v58  ;;  %v723_v8 = vmul.f32 %v1355_v20, %v1355_v20 }
 0x14c   :  { %v648_v49 = vadd.f32 %v647_v59, %v1313_v12  ;;  %v783_v33 = vadd.f32 %v782_v17, %v720_v40  ;;  %v725_v12 = vmul.f32 %v1397_v28, %v1397_v28 }
 0x14e   :  { %v649_v57 = vadd.f32 %v648_v49, %v1334_v16  ;;  %v784_v29 = vadd.f32 %v783_v33, %v721_v31  ;;  %v726_v16 = vmul.f32 %v1420_v43, %v1420_v43 }
 0x150   :  { %v650_v30 = vadd.f32 %v649_v57, %v1355_v20  ;;  %v785_v0 = vadd.f32 %v784_v29, %v722_v21  ;;  %v727_v20 = vmul.f32 %v1441_v2, %v1441_v2 }
 0x152   :  { %v651_v3 = vadd.f32 %v650_v30, %v1376_v24  ;;  %v786_v1 = vadd.f32 %v785_v0, %v723_v8  ;;  %v728_v24 = vmul.f32 %v1462_v41, %v1462_v41 }
 0x154   :  { %v652_v25 = vadd.f32 %v651_v3, %v1397_v28  ;;  %v787_v6 = vadd.f32 %v786_v1, %v724_v60  ;;  %v729_v28 = vmul.f32 %v1490_v61, %v1490_v61 }
 0x156   :  { %v788_v4 = vadd.f32 %v787_v6, %v725_v12  ;;  %v653_v34 = vadd.f32 %v652_v25, %v1420_v43  ;;  %v730_v43 = vmul.f32 %v1514_v32, %v1514_v32 }
 0x158   :  { %v654_v38 = vadd.f32 %v653_v34, %v1441_v2  ;;  %v789_v36 = vadd.f32 %v788_v4, %v726_v16 }
 0x15a   :  { %v655_v44 = vadd.f32 %v654_v38, %v1462_v41  ;;  %v790_v46 = vadd.f32 %v789_v36, %v727_v20 }
 0x15c   :  { %v656_v10 = vadd.f32 %v655_v44, %v1490_v61  ;;  %v791_v11 = vadd.f32 %v790_v46, %v728_v24 }
 0x15e   :  { %v657_v47 = vadd.f32 %v656_v10, %v1514_v32  ;;  %v792_v48 = vadd.f32 %v791_v11, %v729_v28 }
 0x160   :  { %v658_v2 = vadd.f32 %v657_v47, %v1538_v35  ;;  %v793_v14 = vadd.f32 %v792_v48, %v730_v43 }
 0x162   :  { %v794_v41 = vadd.f32 %v793_v14, %v731_v15  ;;  %v659_v19 = vadd.f32 %v658_v2, %v1560_v51 }
 0x164   :  { %v795_v61 = vadd.f32 %v794_v41, %v732_v18  ;;  %v660_v50 = vadd.f32 %v659_v19, %v1578_v54 }
 0x166   :  { %v796_v32 = vadd.f32 %v795_v61, %v733_v22  ;;  %v661_v52 = vadd.f32 %v660_v50, %v1596_v7  ;;  %v599_v7 = vld [vmem:[%s1701_s3] sm:$0x1] }
 0x168   :  { %v797_v35 = vadd.f32 %v796_v32, %v734_v53  ;;  %v662_v55 = vadd.f32 %v661_v52, %v1614_v23  ;;  %v671_v23 = vld [vmem:[%s1702_s4] sm:$0x1] }
 0x16a   :  { %v663_v56 = vrot.slane %v662_v55, 4  ;;  %v798_v51 = vadd.f32 %v797_v35, %v735_v27 }
 0x16c   :  { %v664_v42 = vadd.f32 %v663_v56, %v662_v55  ;;  %v799_v39 = vrot.slane %v798_v51, 4 }
 0x16e   :  { %v665_v45 = vrot.slane %v664_v42, 2  ;;  %v800_v63 = vadd.f32 %v799_v39, %v798_v51 }
 0x170   :  { %v666_v26 = vadd.f32 %v665_v45, %v664_v42  ;;  %v801_v54 = vrot.slane %v800_v63, 2 }
 0x172   :  { %v667_v62 = vrot.slane %v666_v26, 1  ;;  %v802_v37 = vadd.f32 %v801_v54, %v800_v63 }
 0x174   :  { %v668_v5 = vadd.f32 %v667_v62, %v666_v26  ;;  %v803_v9 = vrot.slane %v802_v37, 1 }
 0x176   :  { %v669_v58 = vadd.f32 %v668_v5, %v599_v7  ;;  %v804_v13 = vadd.f32 %v803_v9, %v802_v37 }
 0x178   :  { %670 = vst [vmem:[%s1701_s3] sm:$0x1] %v669_v58  ;;  %v805_v40 = vadd.f32 %v804_v13, %v671_v23 }
 0x17a   :  { %806 = vst [vmem:[%s1702_s4] sm:$0x1] %v805_v40 }

</bundles_post_ra>
